<compile_context>
chip_gen: v7x
topology: tpu7x:2x2x1
jax: 0.10.0
libtpu: 0.0.40
codegen_flags: <defaults>
</compile_context>

<pallas_src>
import functools

import jax
import jax.numpy as jnp
from jax import lax
from jax.experimental import pallas as pl
from jax.experimental.pallas import tpu as pltpu

_CLAMP_LO = 0.0005
_CLAMP_HI = 0.9995


def _round_up(x: int, m: int) -> int:
    return ((x + m - 1) // m) * m


def _sim_min_loss_kernel(bg_ref, inv_bg_ref, fg_ref, inv_fg_ref, out_ref,
                         acc_ref, *, tn, fg_resident):
    j = pl.program_id(1)

    bg = bg_ref[...]                                    # [tm, C], native dtype
    if fg_resident:
        off = pl.multiple_of(j * tn, tn)
        fg = fg_ref[pl.ds(off, tn), :]                  # [tn, C] slice of resident fg
    else:
        fg = fg_ref[...]                                # [tn, C] streamed tile

    # MXU: contract over channels directly (no fg transpose materialized).
    raw = lax.dot_general(
        bg, fg,
        dimension_numbers=(((1,), (1,)), ((), ())),
        preferred_element_type=jnp.float32)             # [tm, tn] f32

    # Cosine similarity via precomputed inverse norms (hoisted out of the grid).
    sim = (raw * inv_bg_ref[...]) * inv_fg_ref[...]     # [tm,1] and [1,tn] bcasts
    sim = jnp.clip(sim, _CLAMP_LO, _CLAMP_HI)
    loss = -jnp.log(1.0 - sim)                          # EUP log

    # Elementwise VMEM accumulator: no serial reduce on the per-step path.
    @pl.when(j == 0)
    def _():
        acc_ref[...] = loss

    @pl.when(j > 0)
    def _():
        acc_ref[...] += loss

    # Finalize this row tile: emit a lane-dense (1, tn) partial sum.
    @pl.when(j == pl.num_programs(1) - 1)
    def _():
        out_ref[...] = jnp.sum(acc_ref[...], axis=0,
                               keepdims=True).reshape(1, 1, tn)


def sim_min_loss(embedded_bg: jax.Array, embedded_fg: jax.Array, *,
                 tile_m: int = 256, tile_n: int = 256,
                 fg_resident_budget_bytes: int = 12 * 1024 * 1024) -> jax.Array:
    """SimMinLoss(metric='cos', reduction='mean') forward.

    embedded_bg, embedded_fg: [N, C]. Returns a scalar float32 loss.
    """
    assert embedded_bg.ndim == 2 and embedded_bg.shape == embedded_fg.shape
    assert tile_m % 8 == 0 and tile_n % 128 == 0
    n, c = embedded_bg.shape
    isz = jnp.dtype(embedded_bg.dtype).itemsize

    # Tile sizes: sublane-aligned rows, lane-dense (>=128) columns.
    tm = min(tile_m, _round_up(n, 8))
    tn = min(tile_n, _round_up(n, 128))
    n_pad_r = _round_up(n, tm)
    n_pad_c = _round_up(n, tn)
    gi = n_pad_r // tm
    gj = n_pad_c // tn

    # Pad rows only when needed; C block equals the full array dim (no C pad).
    bg = embedded_bg if n_pad_r == n else jnp.pad(
        embedded_bg, ((0, n_pad_r - n), (0, 0)))
    fg = embedded_fg if n_pad_c == n else jnp.pad(
        embedded_fg, ((0, n_pad_c - n), (0, 0)))

    # F.normalize(x, dim=1, eps=1e-12)  ==  x * rsqrt(max(sumsq, 1e-24)).
    bg_f = bg.astype(jnp.float32)
    fg_f = fg.astype(jnp.float32)
    inv_bg = lax.rsqrt(
        jnp.maximum(jnp.sum(bg_f * bg_f, axis=1, keepdims=True), 1e-24))   # [n_pad_r, 1]
    inv_fg = lax.rsqrt(
        jnp.maximum(jnp.sum(fg_f * fg_f, axis=1), 1e-24)).reshape(1, n_pad_c)  # [1, n_pad_c]

    fg_bytes = n_pad_c * c * isz
    fg_resident = fg_bytes <= fg_resident_budget_bytes
    fg_spec = (pl.BlockSpec((n_pad_c, c), lambda i, j: (0, 0)) if fg_resident
               else pl.BlockSpec((tn, c), lambda i, j: (j, 0)))

    # Footprint-derived VMEM limit (safe on v7x's 64 MiB, roomy on v5e/v6e).
    fg_vmem_bytes = fg_bytes if fg_resident else tn * c * isz
    footprint = (2 * tm * c * isz          # bg tile (double-buffered)
                 + 2 * fg_vmem_bytes       # fg (resident or streamed tile)
                 + 2 * (tm + tn) * 4       # inverse-norm vectors
                 + tm * tn * 4             # f32 accumulator scratch
                 + 2 * tn * 4)             # partial-sum output block
    vmem_limit = int(min(max(footprint + (8 << 20), 32 << 20), 56 << 20))

    kernel = functools.partial(_sim_min_loss_kernel, tn=tn,
                               fg_resident=fg_resident)
    fg_reads = 1 if fg_resident else gi

    partial = pl.pallas_call(
        kernel,
        out_shape=jax.ShapeDtypeStruct((gi, 1, tn), jnp.float32),
        grid_spec=pltpu.PrefetchScalarGridSpec(
            num_scalar_prefetch=0,
            grid=(gi, gj),
            in_specs=[
                pl.BlockSpec((tm, c), lambda i, j: (i, 0)),   # bg row tile
                pl.BlockSpec((tm, 1), lambda i, j: (i, 0)),   # inv_bg column
                fg_spec,                                       # fg (resident/streamed)
                pl.BlockSpec((1, tn), lambda i, j: (0, j)),   # inv_fg row (lane-major)
            ],
            out_specs=pl.BlockSpec((1, 1, tn), lambda i, j: (i, 0, 0)),
            scratch_shapes=[pltpu.VMEM((tm, tn), jnp.float32)],
        ),
        compiler_params=pltpu.CompilerParams(
            # Row-tile axis is independent (per-i partial sums) -> parallel;
            # column axis carries the accumulator -> arbitrary.
            dimension_semantics=("parallel", "arbitrary"),
            vmem_limit_bytes=vmem_limit,
        ),
        cost_estimate=pl.CostEstimate(
            flops=2 * n_pad_r * n_pad_c * c,
            transcendentals=n_pad_r * n_pad_c,
            bytes_accessed=(n_pad_r * c * isz
                            + fg_reads * n_pad_c * c * isz
                            + (n_pad_r + n_pad_c) * 4
                            + gi * tn * 4),
        ),
    )(bg, inv_bg, fg, inv_fg)

    # Tiny JAX epilogue: reduce the (gi, 1, tn) partial sums, subtract the exact
    # constant contributed by zero-padded rows/cols, divide by the true N^2.
    total = jnp.sum(partial, dtype=jnp.float32)
    pad_cells = n_pad_r * n_pad_c - n * n
    pad_const = -jnp.log(jnp.float32(1.0) - jnp.float32(_CLAMP_LO))
    return (total - jnp.float32(pad_cells) * pad_const) / jnp.float32(n * n)


def _reference(embedded_bg, embedded_fg):
    # Pure-JAX reference of the PyTorch forward, for verification.
    eps = 1e-12
    bg = embedded_bg.astype(jnp.float32)
    fg = embedded_fg.astype(jnp.float32)
    bg_n = bg / jnp.maximum(jnp.linalg.norm(bg, axis=1, keepdims=True), eps)
    fg_n = fg / jnp.maximum(jnp.linalg.norm(fg, axis=1, keepdims=True), eps)
    sim = jnp.clip(bg_n @ fg_n.T, 0.0005, 0.9995)
    return jnp.mean(-jnp.log(1.0 - sim))


if __name__ == "__main__":
    key = jax.random.PRNGKey(0)
    k_bg, k_fg, k_bg2, k_fg2 = jax.random.split(key, 4)

    # Small case matching the module's [N, C] embeddings.
    N, C = 8, 32
    embedded_bg = jax.random.normal(k_bg, (N, C), dtype=jnp.float32)
    embedded_fg = jax.random.normal(k_fg, (N, C), dtype=jnp.float32)
    loss = jax.block_until_ready(sim_min_loss(embedded_bg, embedded_fg))
    ref = _reference(embedded_bg, embedded_fg)
    assert jnp.allclose(loss, ref, rtol=1e-5, atol=1e-5), (loss, ref)

    # Multi-tile grid + row/col padding + analytic padding correction,
    # resident-fg path.
    N2, C2 = 150, 96
    bg2 = jax.random.normal(k_bg2, (N2, C2), dtype=jnp.float32)
    fg2 = jax.random.normal(k_fg2, (N2, C2), dtype=jnp.float32)
    loss2 = jax.block_until_ready(sim_min_loss(bg2, fg2, tile_m=64, tile_n=128))
    ref2 = _reference(bg2, fg2)
    assert jnp.allclose(loss2, ref2, rtol=1e-5, atol=1e-5), (loss2, ref2)

    # Same problem, streamed-fg path (force budget to 0).
    loss3 = jax.block_until_ready(
        sim_min_loss(bg2, fg2, tile_m=64, tile_n=128,
                     fg_resident_budget_bytes=0))
    assert jnp.allclose(loss3, ref2, rtol=1e-5, atol=1e-5), (loss3, ref2)

    print("KERNEL_OK")
</pallas_src>

<mosaic_0001>
module attributes {stable_mosaic.version = 11 : i64} {
  func.func @_sim_min_loss_kernel(%arg0: i32, %arg1: i32, %arg2: memref<8x32xf32, #tpu.memory_space<vmem>>, %arg3: memref<8x1xf32, #tpu.memory_space<vmem>>, %arg4: memref<128x32xf32, #tpu.memory_space<vmem>>, %arg5: memref<1x128xf32, #tpu.memory_space<vmem>>, %arg6: memref<1x1x128xf32, #tpu.memory_space<vmem>>, %arg7: memref<8x128xf32, #tpu.memory_space<vmem>>) attributes {dimension_semantics = [#tpu.dimension_semantics<parallel>, #tpu.dimension_semantics<arbitrary>], iteration_bounds = array<i64: 1, 1>, scalar_prefetch = 0 : i64, scratch_operands = 1 : i64, tpu.core_type = #tpu.core_type<tc>, window_params = [{transform_indices = @transform_0, window_bounds = array<i64: 8, 32>}, {transform_indices = @transform_1, window_bounds = array<i64: 8, 1>}, {pipeline_mode = #tpu.pipeline_mode<synchronous>, transform_indices = @transform_2, window_bounds = array<i64: 128, 32>}, {transform_indices = @transform_3, window_bounds = array<i64: 1, 128>}, {transform_indices = @transform_4, window_bounds = array<i64: 1, 1, 128>}]} {
    %c0 = arith.constant 0 : index
    %c0_0 = arith.constant 0 : index
    %0 = vector.load %arg2[%c0, %c0_0] : memref<8x32xf32, #tpu.memory_space<vmem>>, vector<8x32xf32>
    %c128_i32 = arith.constant 128 : i32
    %1 = arith.muli %arg1, %c128_i32 : i32
    %2 = tpu.assume_multiple %1, 128 : i32
    %3 = arith.index_cast %2 : i32 to index
    %c0_1 = arith.constant 0 : index
    %4 = vector.load %arg4[%3, %c0_1] : memref<128x32xf32, #tpu.memory_space<vmem>>, vector<128x32xf32>
    %cst = arith.constant dense<0.000000e+00> : vector<8x128xf32>
    %5 = tpu.matmul %0, %4, %cst {dimension_numbers = #tpu.dot_dimension_numbers<[1], [1], [0], [0], [0, 0, 1, 0], [], []>} : vector<8x32xf32>, vector<128x32xf32>, vector<8x128xf32> -> vector<8x128xf32>
    %c0_2 = arith.constant 0 : index
    %c0_3 = arith.constant 0 : index
    %6 = vector.load %arg3[%c0_2, %c0_3] : memref<8x1xf32, #tpu.memory_space<vmem>>, vector<8x1xf32>
    %7 = vector.broadcast %6 : vector<8x1xf32> to vector<8x128xf32>
    %8 = arith.mulf %5, %7 : vector<8x128xf32>
    %c0_4 = arith.constant 0 : index
    %c0_5 = arith.constant 0 : index
    %9 = vector.load %arg5[%c0_4, %c0_5] : memref<1x128xf32, #tpu.memory_space<vmem>>, vector<1x128xf32>
    %10 = vector.broadcast %9 : vector<1x128xf32> to vector<8x128xf32>
    %11 = arith.mulf %8, %10 : vector<8x128xf32>
    %cst_6 = arith.constant 5.000000e-04 : f32
    %cst_7 = arith.constant 0.999499976 : f32
    %12 = vector.broadcast %cst_6 : f32 to vector<8x128xf32>
    %13 = arith.maximumf %12, %11 : vector<8x128xf32>
    %14 = vector.broadcast %cst_7 : f32 to vector<8x128xf32>
    %15 = arith.minimumf %14, %13 : vector<8x128xf32>
    %cst_8 = arith.constant 1.000000e+00 : f32
    %16 = vector.broadcast %cst_8 : f32 to vector<8x128xf32>
    %17 = arith.subf %16, %15 : vector<8x128xf32>
    %18 = math.log %17 : vector<8x128xf32>
    %cst_9 = arith.constant 0.000000e+00 : f32
    %19 = vector.broadcast %cst_9 : f32 to vector<8x128xf32>
    %20 = arith.subf %19, %18 : vector<8x128xf32>
    %c0_i32 = arith.constant 0 : i32
    %21 = arith.cmpi eq, %arg1, %c0_i32 : i32
    %22 = arith.extui %21 : i1 to i32
    %c0_i32_10 = arith.constant 0 : i32
    %23 = arith.cmpi ne, %22, %c0_i32_10 : i32
    scf.if %23 {
      %c0_15 = arith.constant 0 : index
      %c0_16 = arith.constant 0 : index
      %30 = vector.load %arg7[%c0_15, %c0_16] : memref<8x128xf32, #tpu.memory_space<vmem>>, vector<8x128xf32>
      tpu.vector_store %arg7[%c0_15, %c0_16], %20 {strides = array<i32>} : memref<8x128xf32, #tpu.memory_space<vmem>>, vector<8x128xf32>,
    } else {
    }
    %c0_i32_11 = arith.constant 0 : i32
    %24 = arith.cmpi sgt, %arg1, %c0_i32_11 : i32
    %25 = arith.extui %24 : i1 to i32
    %c0_i32_12 = arith.constant 0 : i32
    %26 = arith.cmpi ne, %25, %c0_i32_12 : i32
    scf.if %26 {
      %c0_15 = arith.constant 0 : index
      %c0_16 = arith.constant 0 : index
      %30 = vector.load %arg7[%c0_15, %c0_16] : memref<8x128xf32, #tpu.memory_space<vmem>>, vector<8x128xf32>
      %31 = arith.addf %30, %20 : vector<8x128xf32>
      %c0_17 = arith.constant 0 : index
      %c0_18 = arith.constant 0 : index
      %32 = vector.load %arg7[%c0_17, %c0_18] : memref<8x128xf32, #tpu.memory_space<vmem>>, vector<8x128xf32>
      tpu.vector_store %arg7[%c0_17, %c0_18], %31 {strides = array<i32>} : memref<8x128xf32, #tpu.memory_space<vmem>>, vector<8x128xf32>,
    } else {
    }
    %c0_i32_13 = arith.constant 0 : i32
    %27 = arith.cmpi eq, %arg1, %c0_i32_13 : i32
    %28 = arith.extui %27 : i1 to i32
    %c0_i32_14 = arith.constant 0 : i32
    %29 = arith.cmpi ne, %28, %c0_i32_14 : i32
    scf.if %29 {
      %c0_15 = arith.constant 0 : index
      %c0_16 = arith.constant 0 : index
      %30 = vector.load %arg7[%c0_15, %c0_16] : memref<8x128xf32, #tpu.memory_space<vmem>>, vector<8x128xf32>
      %cst_17 = arith.constant dense<0.000000e+00> : vector<128xf32>
      %31 = vector.multi_reduction <add>, %30, %cst_17 [0] : vector<8x128xf32> to vector<128xf32>
      %32 = vector.shape_cast %31 : vector<128xf32> to vector<1x128xf32>
      %33 = vector.shape_cast %32 : vector<1x128xf32> to vector<1x1x128xf32>
      %c0_18 = arith.constant 0 : index
      %c0_19 = arith.constant 0 : index
      %c0_20 = arith.constant 0 : index
      %34 = vector.load %arg6[%c0_18, %c0_19, %c0_20] : memref<1x1x128xf32, #tpu.memory_space<vmem>>, vector<1x1x128xf32>
      tpu.vector_store %arg6[%c0_18, %c0_19, %c0_20], %33 {strides = array<i32>} : memref<1x1x128xf32, #tpu.memory_space<vmem>>, vector<1x1x128xf32>,
    } else {
    }
    return
  }
  func.func @transform_0(%arg0: i32, %arg1: i32) -> (i32, i32) {
    %c0_i32 = arith.constant 0 : i32
    %c0_i32_0 = arith.constant 0 : i32
    return %arg0, %c0_i32 : i32, i32
  }
  func.func @transform_1(%arg0: i32, %arg1: i32) -> (i32, i32) {
    %c0_i32 = arith.constant 0 : i32
    %c0_i32_0 = arith.constant 0 : i32
    return %arg0, %c0_i32 : i32, i32
  }
  func.func @transform_2(%arg0: i32, %arg1: i32) -> (i32, i32) {
    %c0_i32 = arith.constant 0 : i32
    %c0_i32_0 = arith.constant 0 : i32
    %c0_i32_1 = arith.constant 0 : i32
    return %c0_i32, %c0_i32_0 : i32, i32
  }
  func.func @transform_3(%arg0: i32, %arg1: i32) -> (i32, i32) {
    %c0_i32 = arith.constant 0 : i32
    %c0_i32_0 = arith.constant 0 : i32
    return %c0_i32, %arg1 : i32, i32
  }
  func.func @transform_4(%arg0: i32, %arg1: i32) -> (i32, i32, i32) {
    %c0_i32 = arith.constant 0 : i32
    %c0_i32_0 = arith.constant 0 : i32
    %c0_i32_1 = arith.constant 0 : i32
    return %arg0, %c0_i32, %c0_i32_0 : i32, i32, i32
  }
}

</mosaic_0001>

<bundles_post_ra>
// kernel: tpu_custom_call.1
= control target key start
LH: loop header
LB: loop body
LE: loop exit
PB: predicated region body
PF: predicated region fallthrough
CT: control target
= control target key end

     0   :  { %vm37_vm0 = vcmask 261120   ;;  %v351_v2 = vmov 0.0|0.0   ;;  %vm352_vm2 = vmmov 0   ;;  %v353_v5 = vmov 0.0   ;;  %s473_s0 = inlined_call_operand.vmem [shape: f32[8,32], index: 0, kind: input, shape index: {}]   ;;  %s474_s1 = inlined_call_operand.vmem [shape: f32[8,1], index: 1, kind: input, shape index: {}]   ;;  %s475_s2 = inlined_call_operand.vmem [shape: f32[128,32], index: 2, kind: input, shape index: {}]   ;;  %s476_s3 = inlined_call_operand.vmem [shape: f32[1,128], index: 3, kind: input, shape index: {}]   ;;  %s477_s4 = inlined_call_operand.hbm [shape: f32[1,1,128], index: 4, kind: output, shape index: {}]  }
   0x1   :  { %v21_v0 = vld [vmem:[%s475_s2] sm:$0xff]  ;;  %v22_v1 = vld [vmem:[%s475_s2 + $0x8] sm:$0xff]  ;;  %287 = vmatprep.subr.bf16.mxu0 %v351_v2  ;;  %vm389_vm1 = vmpackc.low %vm37_vm0, %vm37_vm0  ;;  %284 = vmatprep.mubr.msk.f32.mxu0 %vm352_vm2, %v353_v5  ;;  %v354_v6 = vmov 0  }
   0x2   :  { %v288_v3 = vpack.c.bf16 %v22_v1, %v21_v0  ;;  %324 = vset.pattern.permute.xlu0 %v354_v6  ;;  %v23_v7 = vld [vmem:[%s475_s2 + $0x10] sm:$0xff]  ;;  %v24_v8 = vld [vmem:[%s475_s2 + $0x18] sm:$0xff]  ;;  %v159_v9 = vld [vmem:[%s474_s1] sm:$0xff] }
   0x4   :  { %290 = vmatpush3.bf16.xpose.msk.msra.mxu0 %vm389_vm1, %v288_v3 }
   0x5   :  { %291 = vmatprep.subr.bf16.mxu0 %v351_v2 }
   0x6   :  { %9 = vsyncpa [#allocation4], 0  ;;  %v292_v10 = vpack.c.bf16 %v24_v8, %v23_v7  ;;  %162 = vperm.xlu0 %324, %v159_v9   ;;  %v25_v11 = vld [vmem:[%s475_s2 + $0x20] sm:$0xff]  ;;  %v26_v12 = vld [vmem:[%s475_s2 + $0x28] sm:$0xff] }
   0x7   :  { %v296_v13 = vpack.c.bf16 %v26_v12, %v25_v11  ;;  %v27_v14 = vld [vmem:[%s475_s2 + $0x30] sm:$0xff]  ;;  %v28_v15 = vld [vmem:[%s475_s2 + $0x38] sm:$0xff]  ;;  %v29_v17 = vld [vmem:[%s475_s2 + $0x40] sm:$0xff] }
   0x8   :  { %v300_v16 = vpack.c.bf16 %v28_v15, %v27_v14  ;;  %v30_v18 = vld [vmem:[%s475_s2 + $0x48] sm:$0xff]  ;;  %v31_v20 = vld [vmem:[%s475_s2 + $0x50] sm:$0xff]  ;;  %v32_v21 = vld [vmem:[%s475_s2 + $0x58] sm:$0xff] }
   0x9   :  { %v304_v19 = vpack.c.bf16 %v30_v18, %v29_v17  ;;  %v308_v22 = vpack.c.bf16 %v32_v21, %v31_v20  ;;  %v33_v23 = vld [vmem:[%s475_s2 + $0x60] sm:$0xff]  ;;  %v34_v24 = vld [vmem:[%s475_s2 + $0x68] sm:$0xff]  ;;  %v35_v26 = vld [vmem:[%s475_s2 + $0x70] sm:$0xff] }
   0xa   :  { %v312_v25 = vpack.c.bf16 %v34_v24, %v33_v23  ;;  %v36_v27 = vld [vmem:[%s475_s2 + $0x78] sm:$0xff]  ;;  %v18_v29 = vld [vmem:[%s473_s0] sm:$0xff]  ;;  %s355_s0 = smov [#allocation3]  }
   0xb   :  { %v316_v28 = vpack.c.bf16 %v36_v27, %v35_v26  ;;  %v234_v32 = vld [vmem:[%s476_s3] ss:$0 sm:$0xff]  ;;  %s209_s2 = sshll.u32 %s355_s0, 4  ;;  %s210_s2 = int_to_ptr.vmem [resolvable:$true] %s209_s2 }
   0xc   :  { %294 = vmatpush3.bf16.xpose.msk.msra.mxu0 %vm389_vm1, %v292_v10  ;;  %s327_s3 = scalar_lea.vmem %s210_s2, 16  ;;  %s331_s26 = scalar_lea.vmem %s210_s2, 32 }
   0xd   :  { %295 = vmatprep.subr.bf16.mxu0 %v351_v2  ;;  %p328_p0 = scmp.ne.s32.totalorder %s210_s2, %s327_s3  ;;  %p332_p1 = scmp.lt.s32.totalorder %s210_s2, %s210_s2 }
   0xe   :  { %p333_p2 = scmp.lt.s32.totalorder %s331_s26, %s327_s3 }
  0x10   :  { %p334_p3 = por %p333_p2, %p332_p1 }
  0x12   :  { %p335_p4 = pnand %p334_p3, %p328_p0 }
  0x14   :  { %298 = vmatpush3.bf16.xpose.msk.msra.mxu0 %vm389_vm1, %v296_v13 }
  0x15   :  { %299 = vmatprep.subr.bf16.mxu0 %v351_v2 }
  0x1c   :  { %302 = vmatpush3.bf16.xpose.msk.msra.mxu0 %vm389_vm1, %v300_v16 }
  0x1d   :  { %303 = vmatprep.subr.bf16.mxu0 %v351_v2 }
  0x24   :  { %306 = vmatpush3.bf16.xpose.msk.msra.mxu0 %vm389_vm1, %v304_v19 }
  0x25   :  { %307 = vmatprep.subr.bf16.mxu0 %v351_v2 }
  0x2c   :  { %310 = vmatpush3.bf16.xpose.msk.msra.mxu0 %vm389_vm1, %v308_v22 }
  0x2d   :  { %311 = vmatprep.subr.bf16.mxu0 %v351_v2 }
  0x34   :  { %314 = vmatpush3.bf16.xpose.msk.msra.mxu0 %vm389_vm1, %v312_v25 }
  0x35   :  { %315 = vmatprep.subr.bf16.mxu0 %v351_v2 }
  0x3c   :  { %318 = vmatpush3.bf16.xpose.msk.msra.mxu0 %vm389_vm1, %v316_v28 }
  0x43   :  { %285 = vmatmul.mubr.msk.f32.vlgmr.msra.gmra.mrb[0].mxu0 %vm37_vm0, %v18_v29 }
  0x85   :  { %v163_v30 = vpop.permute.xlu0 %162 }
 0x116   :  { %v155_v31 = vpop.f32.mrb[0].mxu0 }
 0x117   :  { %v165_v33 = vmul.f32 %v163_v30, %v155_v31  ;;  %v286_v34 = vpop.f32.mrb[1].mxu0 }
 0x119   :  { %v173_v35 = vmul.f32 %v234_v32, %v165_v33 }
 0x11b   :  { %v174_v36 = vmax.f32 %v173_v35, 0.0005 }
 0x11d   :  { %v175_v37 = vmin.f32 %v174_v36, 0.9995 }
 0x11f   :  { %v176_v38 = vsub.f32 1.0, %v175_v37 }
 0x121   :  { %325 = vlog2.f32 %v176_v38 }
 0x12b   :  { %v326_v39 = vpop.eup %325 }
 0x12c   :  { %v178_v40 = vmul.f32 0.6931472, %v326_v39 }
 0x12e   :  { %v179_v41 = vsub.f32 0.0, %v178_v40 }
 0x130   :  { %v196_v42 = vrot.slane %v179_v41, 4 }
 0x132   :  { %v197_v43 = vadd.f32 %v196_v42, %v179_v41 }
 0x134   :  { %v198_v44 = vrot.slane %v197_v43, 2 }
 0x136   :  { %v199_v45 = vadd.f32 %v198_v44, %v197_v43 }
 0x138   :  { %v200_v46 = vrot.slane %v199_v45, 1 }
 0x13a   :  { %v201_v47 = vadd.f32 %v200_v46, %v199_v45 }
 0x13c   :  { %202 = vst [vmem:[#allocation3] sm:$0x1] %v201_v47 }
 0x13d   :  { %338 = shalt.err (!%p335_p4)
}
 0x13e   :  { %s339_s1 = scalar_lea.hbm %s477_s4, 16 }
 0x13f   :  { %p340_p5 = scmp.ne.s32.totalorder %s477_s4, %s339_s1  ;;  %p343_p6 = scmp.lt.u32.totalorder %s339_s1, %s477_s4 }
 0x141   :  { %p345_p7 = pnand %p343_p6, %p340_p5 }
 0x143   :  { %348 = shalt.err (!%p345_p7)
}
 0x144   :  { %212 = dma.vmem_to_hbm [thread:$0]  %s210_s2, 16, %s477_s4, [#allocation4]  }
 0x145   :  { %349 = dma.done.wait [#allocation4], 16  }
 0x146   :  { %350 = vsyncadd [#allocation4], 4294967280 }
 0x147   :  { %216 = vsyncpa [#allocation4], 1 }

</bundles_post_ra>
